<compile_context>
chip_gen: v7x
topology: tpu7x:2x2x1
jax: 0.10.0
libtpu: 0.0.40
codegen_flags: <defaults>
</compile_context>

<pallas_src>
import functools

import jax
import jax.numpy as jnp
from jax import lax
from jax.experimental import pallas as pl
from jax.experimental.pallas import tpu as pltpu


def _hash_u32(x):
    # splitmix32-style integer hash (uint32, wraps mod 2**32).
    x = (x ^ (x >> 16)) * jnp.uint32(0x7FEB352D)
    x = (x ^ (x >> 15)) * jnp.uint32(0x846CA68B)
    x = x ^ (x >> 16)
    return x


def flatten_dense_block_kernel(seed_ref,                         # scalar-prefetch (SMEM): (1,) int32
                               x_ref, w_ref, b_ref, g_ref, be_ref,  # VMEM inputs
                               o_ref,                            # VMEM output
                               *, dropout_rate, eps, tn, dout_total,
                               use_bf16_matmul):
    x = x_ref[...]                        # (N, Din) f32, resident across the grid
    w = w_ref[...]                        # (Din, TN) f32
    if use_bf16_matmul:
        # Optional MXU speedup on v6e/v7x; accumulation stays f32.
        x = x.astype(jnp.bfloat16)
        w = w.astype(jnp.bfloat16)

    # --- Linear: y = x @ W + b ----------------------------------------------
    y = jnp.dot(x, w, preferred_element_type=jnp.float32) + b_ref[...]   # (N, TN)

    # --- BatchNorm1d (training mode: biased batch stats over the batch axis) -
    mean = jnp.mean(y, axis=0, keepdims=True)                    # (1, TN)
    centered = y - mean
    var = jnp.mean(centered * centered, axis=0, keepdims=True)   # (1, TN)
    inv = lax.rsqrt(var + eps)                                   # (1, TN)

    # Fuse BN affine + dropout inverted scaling into one per-feature scale/shift.
    # drop_scale > 0, so folding it before the ReLU is exact.
    drop_scale = 1.0 / (1.0 - dropout_rate) if dropout_rate > 0.0 else 1.0
    g_inv = g_ref[...] * inv
    s = g_inv * drop_scale                                       # (1, TN)
    t = (be_ref[...] - mean * g_inv) * drop_scale                # (1, TN)

    # --- Activation (ReLU) applied to the fused FMA ---------------------------
    y = jnp.maximum(y * s + t, 0.0)

    # --- Dropout (training, integer-threshold compare on hashed indices) ------
    if dropout_rate > 0.0:
        col0 = (pl.program_id(0) * tn).astype(jnp.uint32)
        rows = lax.broadcasted_iota(jnp.uint32, y.shape, 0)
        cols = lax.broadcasted_iota(jnp.uint32, y.shape, 1) + col0
        lin = rows * jnp.uint32(dout_total) + cols               # global element id
        seed_u = seed_ref[0].astype(jnp.uint32)
        h = _hash_u32(lin ^ (seed_u * jnp.uint32(0x9E3779B9)))
        h = _hash_u32(h + seed_u)
        thresh = jnp.uint32(min(int(round(dropout_rate * 2.0 ** 32)), 2 ** 32 - 1))
        y = jnp.where(h >= thresh, y, 0.0)

    o_ref[...] = y


def flatten_dense_block(x, w, b, gamma, beta, seed, *,
                        dropout_rate=0.1, eps=1e-5,
                        tile_n=512, use_bf16_matmul=False):
    """x: (N, *in_size); w: (Din, Dout) (pre-transposed); b/gamma/beta: (1, Dout); seed: (1,) i32."""
    N = x.shape[0]
    x2 = x.reshape(N, -1).astype(jnp.float32)       # Flatten
    Din = x2.shape[1]
    Dout = w.shape[1]

    # Lane-dense tile over the output-feature axis (multiple of 128).
    tn = min(tile_n, ((Dout + 127) // 128) * 128)
    dout_p = pl.cdiv(Dout, tn) * tn
    grid = (dout_p // tn,)

    pad = dout_p - Dout
    if pad:
        w = jnp.pad(w, ((0, 0), (0, pad)))
        b = jnp.pad(b, ((0, 0), (0, pad)))
        gamma = jnp.pad(gamma, ((0, 0), (0, pad)))
        beta = jnp.pad(beta, ((0, 0), (0, pad)))

    kernel = functools.partial(
        flatten_dense_block_kernel,
        dropout_rate=float(dropout_rate), eps=float(eps),
        tn=tn, dout_total=dout_p, use_bf16_matmul=use_bf16_matmul)

    out = pl.pallas_call(
        kernel,
        out_shape=jax.ShapeDtypeStruct((N, dout_p), jnp.float32),
        grid_spec=pltpu.PrefetchScalarGridSpec(
            num_scalar_prefetch=1,
            grid=grid,
            in_specs=[
                pl.BlockSpec((N, Din),  lambda j, seed: (0, 0)),   # x: resident, DMA'd once
                pl.BlockSpec((Din, tn), lambda j, seed: (0, j)),   # W tile
                pl.BlockSpec((1, tn),   lambda j, seed: (0, j)),   # bias
                pl.BlockSpec((1, tn),   lambda j, seed: (0, j)),   # gamma
                pl.BlockSpec((1, tn),   lambda j, seed: (0, j)),   # beta
            ],
            out_specs=pl.BlockSpec((N, tn), lambda j, seed: (0, j)),
        ),
        compiler_params=pltpu.CompilerParams(
            dimension_semantics=("parallel",),      # shard Dout tiles across TCs (v7x)
            vmem_limit_bytes=48 * 1024 * 1024),     # headroom under v7x's 64 MiB VMEM
    )(seed, x2, w, b, gamma, beta)

    return out[:, :Dout]


if __name__ == "__main__":
    # Small shapes consistent with the module: in_size=(4,4,2) -> flatten 32, out_size=64.
    IN_SIZE = (4, 4, 2)
    OUT_SIZE = 64
    BATCH = 8
    DROPOUT_RATE = 0.1

    key = jax.random.PRNGKey(0)
    kx, kw, kb = jax.random.split(key, 3)

    x = jax.random.normal(kx, (BATCH,) + IN_SIZE, dtype=jnp.float32)

    din = 1
    for d in IN_SIZE:
        din *= d
    bound = 1.0 / (din ** 0.5)
    # nn.Linear weight stored pre-transposed as (Din, Dout) for x @ W on the MXU.
    w = jax.random.uniform(kw, (din, OUT_SIZE), jnp.float32, -bound, bound)
    b = jax.random.uniform(kb, (1, OUT_SIZE), jnp.float32, -bound, bound)
    # BatchNorm1d affine params at init.
    gamma = jnp.ones((1, OUT_SIZE), jnp.float32)
    beta = jnp.zeros((1, OUT_SIZE), jnp.float32)

    seed = jnp.array([1234], dtype=jnp.int32)

    out = flatten_dense_block(x, w, b, gamma, beta, seed,
                              dropout_rate=DROPOUT_RATE)
    out = jax.block_until_ready(out)

    assert out.shape == (BATCH, OUT_SIZE)
    assert out.dtype == jnp.float32
    assert bool(jnp.all(jnp.isfinite(out)))
    print("KERNEL_OK")
</pallas_src>

<mosaic_0001>
module attributes {stable_mosaic.version = 11 : i64} {
  func.func @flatten_dense_block_kernel(%arg0: i32, %arg1: memref<1xi32, #tpu.memory_space<smem>>, %arg2: memref<8x32xf32, #tpu.memory_space<vmem>>, %arg3: memref<32x128xf32, #tpu.memory_space<vmem>>, %arg4: memref<1x128xf32, #tpu.memory_space<vmem>>, %arg5: memref<1x128xf32, #tpu.memory_space<vmem>>, %arg6: memref<1x128xf32, #tpu.memory_space<vmem>>, %arg7: memref<8x128xf32, #tpu.memory_space<vmem>>) attributes {dimension_semantics = [#tpu.dimension_semantics<parallel>], iteration_bounds = array<i64: 1>, scalar_prefetch = 1 : i64, scratch_operands = 0 : i64, tpu.core_type = #tpu.core_type<tc>, window_params = [{pipeline_mode = #tpu.pipeline_mode<synchronous>, transform_indices = @transform_0, window_bounds = array<i64: 8, 32>}, {transform_indices = @transform_1, window_bounds = array<i64: 32, 128>}, {transform_indices = @transform_2, window_bounds = array<i64: 1, 128>}, {transform_indices = @transform_3, window_bounds = array<i64: 1, 128>}, {transform_indices = @transform_4, window_bounds = array<i64: 1, 128>}, {transform_indices = @transform_5, window_bounds = array<i64: 8, 128>}]} {
    %c0 = arith.constant 0 : index
    %c0_0 = arith.constant 0 : index
    %0 = vector.load %arg2[%c0, %c0_0] : memref<8x32xf32, #tpu.memory_space<vmem>>, vector<8x32xf32>
    %c0_1 = arith.constant 0 : index
    %c0_2 = arith.constant 0 : index
    %1 = vector.load %arg3[%c0_1, %c0_2] : memref<32x128xf32, #tpu.memory_space<vmem>>, vector<32x128xf32>
    %cst = arith.constant dense<0.000000e+00> : vector<8x128xf32>
    %2 = tpu.matmul %0, %1, %cst {dimension_numbers = #tpu.dot_dimension_numbers<[1], [0], [0], [1], [0, 0, 1, 1], [], []>} : vector<8x32xf32>, vector<32x128xf32>, vector<8x128xf32> -> vector<8x128xf32>
    %c0_3 = arith.constant 0 : index
    %c0_4 = arith.constant 0 : index
    %3 = vector.load %arg4[%c0_3, %c0_4] : memref<1x128xf32, #tpu.memory_space<vmem>>, vector<1x128xf32>
    %4 = vector.broadcast %3 : vector<1x128xf32> to vector<8x128xf32>
    %5 = arith.addf %2, %4 : vector<8x128xf32>
    %cst_5 = arith.constant dense<0.000000e+00> : vector<128xf32>
    %6 = vector.multi_reduction <add>, %5, %cst_5 [0] : vector<8x128xf32> to vector<128xf32>
    %7 = vector.shape_cast %6 : vector<128xf32> to vector<1x128xf32>
    %cst_6 = arith.constant 8.000000e+00 : f32
    %8 = vector.broadcast %cst_6 : f32 to vector<1x128xf32>
    %9 = arith.divf %7, %8 : vector<1x128xf32>
    %10 = vector.broadcast %9 : vector<1x128xf32> to vector<8x128xf32>
    %11 = arith.subf %5, %10 : vector<8x128xf32>
    %12 = arith.mulf %11, %11 : vector<8x128xf32>
    %cst_7 = arith.constant dense<0.000000e+00> : vector<128xf32>
    %13 = vector.multi_reduction <add>, %12, %cst_7 [0] : vector<8x128xf32> to vector<128xf32>
    %14 = vector.shape_cast %13 : vector<128xf32> to vector<1x128xf32>
    %cst_8 = arith.constant 8.000000e+00 : f32
    %15 = vector.broadcast %cst_8 : f32 to vector<1x128xf32>
    %16 = arith.divf %14, %15 : vector<1x128xf32>
    %cst_9 = arith.constant 9.99999974E-6 : f32
    %17 = vector.broadcast %cst_9 : f32 to vector<1x128xf32>
    %18 = arith.addf %16, %17 : vector<1x128xf32>
    %19 = math.rsqrt %18 : vector<1x128xf32>
    %c0_10 = arith.constant 0 : index
    %c0_11 = arith.constant 0 : index
    %20 = vector.load %arg5[%c0_10, %c0_11] : memref<1x128xf32, #tpu.memory_space<vmem>>, vector<1x128xf32>
    %21 = arith.mulf %20, %19 : vector<1x128xf32>
    %cst_12 = arith.constant 1.11111116 : f32
    %22 = vector.broadcast %cst_12 : f32 to vector<1x128xf32>
    %23 = arith.mulf %21, %22 : vector<1x128xf32>
    %c0_13 = arith.constant 0 : index
    %c0_14 = arith.constant 0 : index
    %24 = vector.load %arg6[%c0_13, %c0_14] : memref<1x128xf32, #tpu.memory_space<vmem>>, vector<1x128xf32>
    %25 = arith.mulf %9, %21 : vector<1x128xf32>
    %26 = arith.subf %24, %25 : vector<1x128xf32>
    %cst_15 = arith.constant 1.11111116 : f32
    %27 = vector.broadcast %cst_15 : f32 to vector<1x128xf32>
    %28 = arith.mulf %26, %27 : vector<1x128xf32>
    %29 = vector.broadcast %23 : vector<1x128xf32> to vector<8x128xf32>
    %30 = arith.mulf %5, %29 : vector<8x128xf32>
    %31 = vector.broadcast %28 : vector<1x128xf32> to vector<8x128xf32>
    %32 = arith.addf %30, %31 : vector<8x128xf32>
    %cst_16 = arith.constant 0.000000e+00 : f32
    %33 = vector.broadcast %cst_16 : f32 to vector<8x128xf32>
    %34 = arith.maximumf %32, %33 : vector<8x128xf32>
    %c128_i32 = arith.constant 128 : i32
    %35 = arith.muli %arg0, %c128_i32 : i32
    %36 = tpu.iota {dimensions = array<i32: 0>} : vector<8x128xi32>
    %37 = tpu.iota {dimensions = array<i32: 1>} : vector<8x128xi32>
    %38 = vector.broadcast %35 : i32 to vector<8x128xi32>
    %39 = arith.addi %37, %38 : vector<8x128xi32>
    %c128_i32_17 = arith.constant 128 : i32
    %40 = vector.broadcast %c128_i32_17 : i32 to vector<8x128xi32>
    %41 = arith.muli %36, %40 : vector<8x128xi32>
    %42 = arith.addi %41, %39 : vector<8x128xi32>
    %c0_18 = arith.constant 0 : index
    %43 = memref.load %arg1[%c0_18] : memref<1xi32, #tpu.memory_space<smem>>
    %c-1640531527_i32 = arith.constant -1640531527 : i32
    %44 = arith.muli %43, %c-1640531527_i32 : i32
    %45 = vector.broadcast %44 : i32 to vector<8x128xi32>
    %46 = arith.xori %42, %45 : vector<8x128xi32>
    %c16_i32 = arith.constant 16 : i32
    %47 = vector.broadcast %c16_i32 : i32 to vector<8x128xi32>
    %48 = arith.shrui %46, %47 : vector<8x128xi32>
    %49 = arith.xori %46, %48 : vector<8x128xi32>
    %c2146121005_i32 = arith.constant 2146121005 : i32
    %50 = vector.broadcast %c2146121005_i32 : i32 to vector<8x128xi32>
    %51 = arith.muli %49, %50 : vector<8x128xi32>
    %c15_i32 = arith.constant 15 : i32
    %52 = vector.broadcast %c15_i32 : i32 to vector<8x128xi32>
    %53 = arith.shrui %51, %52 : vector<8x128xi32>
    %54 = arith.xori %51, %53 : vector<8x128xi32>
    %c-2073254261_i32 = arith.constant -2073254261 : i32
    %55 = vector.broadcast %c-2073254261_i32 : i32 to vector<8x128xi32>
    %56 = arith.muli %54, %55 : vector<8x128xi32>
    %c16_i32_19 = arith.constant 16 : i32
    %57 = vector.broadcast %c16_i32_19 : i32 to vector<8x128xi32>
    %58 = arith.shrui %56, %57 : vector<8x128xi32>
    %59 = arith.xori %56, %58 : vector<8x128xi32>
    %60 = vector.broadcast %43 : i32 to vector<8x128xi32>
    %61 = arith.addi %59, %60 : vector<8x128xi32>
    %c16_i32_20 = arith.constant 16 : i32
    %62 = vector.broadcast %c16_i32_20 : i32 to vector<8x128xi32>
    %63 = arith.shrui %61, %62 : vector<8x128xi32>
    %64 = arith.xori %61, %63 : vector<8x128xi32>
    %c2146121005_i32_21 = arith.constant 2146121005 : i32
    %65 = vector.broadcast %c2146121005_i32_21 : i32 to vector<8x128xi32>
    %66 = arith.muli %64, %65 : vector<8x128xi32>
    %c15_i32_22 = arith.constant 15 : i32
    %67 = vector.broadcast %c15_i32_22 : i32 to vector<8x128xi32>
    %68 = arith.shrui %66, %67 : vector<8x128xi32>
    %69 = arith.xori %66, %68 : vector<8x128xi32>
    %c-2073254261_i32_23 = arith.constant -2073254261 : i32
    %70 = vector.broadcast %c-2073254261_i32_23 : i32 to vector<8x128xi32>
    %71 = arith.muli %69, %70 : vector<8x128xi32>
    %c16_i32_24 = arith.constant 16 : i32
    %72 = vector.broadcast %c16_i32_24 : i32 to vector<8x128xi32>
    %73 = arith.shrui %71, %72 : vector<8x128xi32>
    %74 = arith.xori %71, %73 : vector<8x128xi32>
    %c429496730_i32 = arith.constant 429496730 : i32
    %75 = vector.broadcast %c429496730_i32 : i32 to vector<8x128xi32>
    %76 = arith.cmpi uge, %74, %75 : vector<8x128xi32>
    %cst_25 = arith.constant 0.000000e+00 : f32
    %77 = vector.broadcast %cst_25 : f32 to vector<8x128xf32>
    %78 = arith.select %76, %34, %77 : vector<8x128xi1>, vector<8x128xf32>
    %c0_26 = arith.constant 0 : index
    %c0_27 = arith.constant 0 : index
    %79 = vector.load %arg7[%c0_26, %c0_27] : memref<8x128xf32, #tpu.memory_space<vmem>>, vector<8x128xf32>
    tpu.vector_store %arg7[%c0_26, %c0_27], %78 {strides = array<i32>} : memref<8x128xf32, #tpu.memory_space<vmem>>, vector<8x128xf32>,
    return
  }
  func.func @transform_0(%arg0: i32, %arg1: memref<1xi32, #tpu.memory_space<smem>>) -> (i32, i32) {
    %c0_i32 = arith.constant 0 : i32
    %c0_i32_0 = arith.constant 0 : i32
    %c0_i32_1 = arith.constant 0 : i32
    return %c0_i32, %c0_i32_0 : i32, i32
  }
  func.func @transform_1(%arg0: i32, %arg1: memref<1xi32, #tpu.memory_space<smem>>) -> (i32, i32) {
    %c0_i32 = arith.constant 0 : i32
    %c0_i32_0 = arith.constant 0 : i32
    return %c0_i32, %arg0 : i32, i32
  }
  func.func @transform_2(%arg0: i32, %arg1: memref<1xi32, #tpu.memory_space<smem>>) -> (i32, i32) {
    %c0_i32 = arith.constant 0 : i32
    %c0_i32_0 = arith.constant 0 : i32
    return %c0_i32, %arg0 : i32, i32
  }
  func.func @transform_3(%arg0: i32, %arg1: memref<1xi32, #tpu.memory_space<smem>>) -> (i32, i32) {
    %c0_i32 = arith.constant 0 : i32
    %c0_i32_0 = arith.constant 0 : i32
    return %c0_i32, %arg0 : i32, i32
  }
  func.func @transform_4(%arg0: i32, %arg1: memref<1xi32, #tpu.memory_space<smem>>) -> (i32, i32) {
    %c0_i32 = arith.constant 0 : i32
    %c0_i32_0 = arith.constant 0 : i32
    return %c0_i32, %arg0 : i32, i32
  }
  func.func @transform_5(%arg0: i32, %arg1: memref<1xi32, #tpu.memory_space<smem>>) -> (i32, i32) {
    %c0_i32 = arith.constant 0 : i32
    %c0_i32_0 = arith.constant 0 : i32
    return %c0_i32, %arg0 : i32, i32
  }
}

</mosaic_0001>

<bundles_post_ra>
// kernel: tpu_custom_call.1
= control target key start
LH: loop header
LB: loop body
LE: loop exit
PB: predicated region body
PF: predicated region fallthrough
CT: control target
= control target key end

     0   :  { %12 = vsyncpa [#allocation5], 0  ;;  %s433_s0 = inlined_call_operand.<no memory space> [shape: s32[1], index: 0, kind: input, shape index: {}]   ;;  %s434_s1 = inlined_call_operand.hbm [shape: f32[8,32], index: 1, kind: input, shape index: {}]   ;;  %s435_s2 = inlined_call_operand.hbm [shape: f32[32,128], index: 2, kind: input, shape index: {}]   ;;  %s436_s3 = inlined_call_operand.vmem [shape: f32[1,128], index: 3, kind: input, shape index: {}]   ;;  %s437_s4 = inlined_call_operand.vmem [shape: f32[1,128], index: 4, kind: input, shape index: {}]   ;;  %s438_s5 = inlined_call_operand.vmem [shape: f32[1,128], index: 5, kind: input, shape index: {}]   ;;  %s439_s6 = inlined_call_operand.hbm [shape: f32[8,128], index: 6, kind: output, shape index: {}]  }
   0x1   :  { %13 = vsyncpa [#allocation8], 0 }
   0x2   :  { %14 = vsyncpa [#allocation6], 0  ;;  %s332_s21 = smov [#allocation4]   ;;  %s333_s23 = smov [#allocation7]  }
   0x3   :  { %s21_s22 = sshll.u32 %s332_s21, 4  ;;  %s30_s24 = sshll.u32 %s333_s23, 4  ;;  %s22_s22 = int_to_ptr.vmem [resolvable:$true] %s21_s22  ;;  %s375_s24 = int_to_ptr.vmem [resolvable:$true] %s30_s24 }
   0x4   :  { %s260_s27 = scalar_lea.hbm %s434_s1, 128 }
   0x5   :  { %p261_p0 = scmp.ne.s32.totalorder %s434_s1, %s260_s27  ;;  %p264_p1 = scmp.lt.u32.totalorder %s260_s27, %s434_s1 }
   0x7   :  { %p266_p2 = pnand %p264_p1, %p261_p0 }
   0x9   :  { %269 = shalt.err (!%p266_p2)
}
   0xa   :  { %s270_s8 = scalar_lea.vmem %s22_s22, 128  ;;  %p275_p4 = scmp.lt.s32.totalorder %s22_s22, %s22_s22 }
   0xb   :  { %p271_p3 = scmp.ne.s32.totalorder %s22_s22, %s270_s8  ;;  %p276_p5 = scmp.lt.s32.totalorder %s270_s8, %s270_s8 }
   0xd   :  { %p277_p6 = por %p276_p5, %p275_p4 }
   0xf   :  { %p278_p7 = pnand %p277_p6, %p271_p3 }
  0x11   :  { %281 = shalt.err (!%p278_p7)
}
  0x12   :  { %24 = dma.hbm_to_vmem [thread:$0]  %s434_s1, 128, %s22_s22, [#allocation5]  }
  0x13   :  { %s282_s13 = scalar_lea.hbm %s435_s2, 512 }
  0x14   :  { %p283_p8 = scmp.ne.s32.totalorder %s435_s2, %s282_s13  ;;  %p286_p9 = scmp.lt.u32.totalorder %s282_s13, %s435_s2 }
  0x16   :  { %p288_p10 = pnand %p286_p9, %p283_p8 }
  0x18   :  { %291 = shalt.err (!%p288_p10)
}
  0x19   :  { %s292_s18 = scalar_lea.vmem %s375_s24, 512  ;;  %p297_p12 = scmp.lt.s32.totalorder %s375_s24, %s375_s24 }
  0x1a   :  { %p293_p11 = scmp.ne.s32.totalorder %s375_s24, %s292_s18  ;;  %p298_p13 = scmp.lt.s32.totalorder %s292_s18, %s292_s18 }
  0x1c   :  { %p299_p0 = por %p298_p13, %p297_p12 }
  0x1e   :  { %p300_p1 = pnand %p299_p0, %p293_p11 }
  0x20   :  { %303 = shalt.err (!%p300_p1)
}
  0x21   :  { %s334_s1 = smov 128   ;;  %s335_s19 = smov 8  }
  0x22   :  { %36 = dma.hbm_to_vmem [thread:$0]  %s435_s2, 512, %s375_s24, [#allocation8], %s334_s1, %s334_s1, %s335_s19  }
  0x23   :  { %326 = dma.done.wait [#allocation5], 128  }
  0x24   :  { %327 = vsyncadd [#allocation5], 4294967168 }
  0x25   :  { %328 = dma.done.wait [#allocation8], 512  }
  0x26   :  { %329 = vsyncadd [#allocation8], 4294966784  ;;  %v336_v0 = vmov 0.0|0.0   ;;  %vm337_vm0 = vmmov 0   ;;  %v338_v1 = vmov 0.0   ;;  %v50_v2 = vld [vmem:[#allocation7] sm:$0xff]  ;;  %v162_v9 = vlaneseq }
  0x27   :  { %244 = vmatprep.subr.bf16.mxu0 %v336_v0  ;;  %241 = vmatprep.mubr.msk.f32.mxu0 %vm337_vm0, %v338_v1  ;;  %v51_v3 = vld [vmem:[#allocation7 + $0x8] sm:$0xff]  ;;  %v52_v4 = vld [vmem:[#allocation7 + $0x10] sm:$0xff]  ;;  %v53_v6 = vld [vmem:[#allocation7 + $0x18] sm:$0xff]  ;;  %vm61_vm1 = vcmask 261120   ;;  %s186_s23 = smul.u32 2654435769, %s433_s0  ;;  %v197_v37 = vstv %s433_s0 }
  0x28   :  { %v245_v5 = vpack.c.bf16 %v51_v3, %v50_v2  ;;  %v248_v7 = vpack.c.bf16 %v53_v6, %v52_v4  ;;  %v49_v8 = vld [vmem:[#allocation4] sm:$0xff]  ;;  %v163_v10 = vshrl.u32 %v162_v9, 7  ;;  %v180_v11 = vand.u32 127, %v162_v9  ;;  %s339_s30 = smov [#allocation9]  }
  0x29   :  { %v187_v14 = vstv %s186_s23  ;;  %v226_v18 = vld [vmem:[%s436_s3] ss:$0 sm:$0xff] }
  0x2a   :  { %246 = vmatpush3.bf16.msra.mxu0 %v245_v5  ;;  %v183_v12 = vmul.u32 128, %v163_v10  ;;  %v154_v52 = vld [vmem:[%s437_s4] sm:$0x1]  ;;  %v164_v56 = vsub.s32 0, %v163_v10  ;;  %s216_s4 = sshll.u32 %s339_s30, 4  ;;  %s217_s4 = int_to_ptr.vmem [resolvable:$true] %s216_s4 }
  0x2b   :  { %247 = vmatprep.subr.bf16.mxu0 %v336_v0  ;;  %v157_v57 = vld [vmem:[%s438_s5] sm:$0x1]  ;;  %s304_s7 = scalar_lea.vmem %s217_s4, 128  ;;  %p309_p3 = scmp.lt.s32.totalorder %s217_s4, %s217_s4 }
  0x2c   :  { %v184_v13 = vadd.s32 %v183_v12, %v180_v11  ;;  %p305_p2 = scmp.ne.s32.totalorder %s217_s4, %s304_s7  ;;  %p310_p4 = scmp.lt.s32.totalorder %s304_s7, %s304_s7 }
  0x2e   :  { %249 = vmatpush3.bf16.msra.mxu0 %v248_v7  ;;  %v188_v15 = vxor.u32 %v187_v14, %v184_v13  ;;  %p311_p5 = por %p310_p4, %p309_p3 }
  0x30   :  { %v189_v16 = vshrl.u32 %v188_v15, 16  ;;  %p312_p6 = pnand %p311_p5, %p305_p2 }
  0x31   :  { %242 = vmatmul.mubr.msk.f32.vlgmr.msra.gmra.mrb[0].mxu0 %vm61_vm1, %v49_v8 }
  0x32   :  { %v190_v17 = vxor.u32 %v189_v16, %v188_v15 }
  0x34   :  { %v191_v19 = vmul.u32 2146121005, %v190_v17 }
  0x36   :  { %v192_v24 = vshrl.u32 %v191_v19, 15 }
  0x38   :  { %v193_v27 = vxor.u32 %v192_v24, %v191_v19 }
  0x3a   :  { %v194_v30 = vmul.u32 2221713035, %v193_v27 }
  0x3c   :  { %v195_v33 = vshrl.u32 %v194_v30, 16 }
  0x3e   :  { %v196_v36 = vxor.u32 %v195_v33, %v194_v30 }
  0x40   :  { %v198_v40 = vadd.s32 %v197_v37, %v196_v36 }
  0x42   :  { %v199_v43 = vshrl.u32 %v198_v40, 16 }
  0x44   :  { %v200_v46 = vxor.u32 %v199_v43, %v198_v40 }
  0x46   :  { %v201_v49 = vmul.u32 2146121005, %v200_v46 }
  0x48   :  { %v202_v50 = vshrl.u32 %v201_v49, 15 }
  0x4a   :  { %v203_v51 = vxor.u32 %v202_v50, %v201_v49 }
  0x4c   :  { %v204_v54 = vmul.u32 2221713035, %v203_v51 }
  0x4e   :  { %v205_v60 = vshrl.u32 %v204_v54, 16 }
  0x50   :  { %v206_v0 = vxor.u32 %v205_v60, %v204_v54 }
  0x52   :  { %vm207_vm2 = vcmp.ge.u32.totalorder %v206_v0, 429496730 }
 0x104   :  { %v131_v20 = vpop.f32.mrb[0].mxu0 }
 0x105   :  { %v132_v21 = vadd.f32 %v226_v18, %v131_v20  ;;  %v243_v22 = vpop.f32.mrb[1].mxu0 }
 0x107   :  { %v135_v23 = vrot.slane %v132_v21, 4 }
 0x109   :  { %v136_v25 = vadd.f32 %v135_v23, %v132_v21 }
 0x10b   :  { %v137_v26 = vrot.slane %v136_v25, 2 }
 0x10d   :  { %v138_v28 = vadd.f32 %v137_v26, %v136_v25 }
 0x10f   :  { %v139_v29 = vrot.slane %v138_v28, 1 }
 0x111   :  { %v140_v31 = vadd.f32 %v139_v29, %v138_v28 }
 0x113   :  { %v142_v32 = vmul.f32 0.125, %v140_v31 }
 0x115   :  { %v143_v34 = vsub.f32 %v132_v21, %v142_v32 }
 0x117   :  { %v144_v35 = vmul.f32 %v143_v34, %v143_v34 }
 0x119   :  { %v145_v38 = vrot.slane %v144_v35, 4 }
 0x11b   :  { %v146_v39 = vadd.f32 %v145_v38, %v144_v35 }
 0x11d   :  { %v147_v41 = vrot.slane %v146_v39, 2 }
 0x11f   :  { %v148_v42 = vadd.f32 %v147_v41, %v146_v39 }
 0x121   :  { %v149_v44 = vrot.slane %v148_v42, 1 }
 0x123   :  { %v150_v45 = vadd.f32 %v149_v44, %v148_v42 }
 0x125   :  { %v151_v47 = vmul.f32 0.125, %v150_v45 }
 0x127   :  { %v152_v48 = vadd.f32 1e-05, %v151_v47 }
 0x129   :  { %258 = vrsqrt.f32 %v152_v48 }
 0x133   :  { %v259_v53 = vpop.eup %258 }
 0x134   :  { %v155_v55 = vmul.f32 %v259_v53, %v154_v52 }
 0x136   :  { %v156_v58 = vmul.f32 1.1111112, %v155_v55  ;;  %v158_v59 = vmul.f32 %v155_v55, %v142_v32 }
 0x138   :  { %v159_v61 = vsub.f32 %v157_v57, %v158_v59  ;;  %v165_v62 = vrot.slane %v156_v58, %v164_v56 }
 0x13a   :  { %v160_v63 = vmul.f32 1.1111112, %v159_v61  ;;  %v167_v1 = vmul.f32 %v165_v62, %v132_v21 }
 0x13c   :  { %v172_v2 = vrot.slane %v160_v63, %v164_v56 }
 0x13e   :  { %v174_v3 = vadd.f32 %v172_v2, %v167_v1 }
 0x140   :  { %v175_v4 = vmax.f32 %v174_v3, 0.0 }
 0x142   :  { %v208_v5 = vsel %vm207_vm2, %v175_v4, 0.0 }
 0x143   :  { %209 = vst [vmem:[#allocation9] sm:$0xff] %v208_v5 }
 0x144   :  { %315 = shalt.err (!%p312_p6)
}
 0x145   :  { %s316_s9 = scalar_lea.hbm %s439_s6, 128 }
 0x146   :  { %p317_p7 = scmp.ne.s32.totalorder %s439_s6, %s316_s9  ;;  %p320_p8 = scmp.lt.u32.totalorder %s316_s9, %s439_s6 }
 0x148   :  { %p322_p9 = pnand %p320_p8, %p317_p7 }
 0x14a   :  { %325 = shalt.err (!%p322_p9)
}
 0x14b   :  { %219 = dma.vmem_to_hbm [thread:$0]  %s217_s4, 128, %s439_s6, [#allocation6]  }
 0x14c   :  { %330 = dma.done.wait [#allocation6], 128  }
 0x14d   :  { %331 = vsyncadd [#allocation6], 4294967168 }
 0x14e   :  { %223 = vsyncpa [#allocation5], 1 }
 0x14f   :  { %224 = vsyncpa [#allocation8], 1 }
 0x150   :  { %225 = vsyncpa [#allocation6], 1 }

</bundles_post_ra>
